<compile_context>
chip_gen: v5e
topology: v5e:2x2
jax: 0.10.0
libtpu: 0.0.40
codegen_flags: <defaults>
</compile_context>

<pallas_src>
import functools

import jax
import jax.numpy as jnp
from jax import lax
from jax.experimental import pallas as pl
from jax.experimental.pallas import tpu as pltpu

_MIB = 1024 * 1024


def _cdiv(a, b):
    return -(-a // b)


def _round_down(a, m):
    return (a // m) * m


def _round_up(a, m):
    return _cdiv(a, m) * m


@functools.lru_cache(maxsize=1)
def _tpu_params():
    """Best-effort (vmem_bytes_per_core, tensorcores_per_chip)."""
    vmem_cap = 64 * _MIB          # conservative fallback = v7x per-TC capacity
    num_cores = 2
    try:
        info = pltpu.get_tpu_info()
        vmem_cap = int(info.vmem_capacity_bytes)
        num_cores = None
        for attr in ("num_cores", "tensorcores_per_chip", "num_tensorcores",
                     "core_count"):
            v = getattr(info, attr, None)
            if v is not None:
                num_cores = int(v)
                break
        if num_cores is None:
            # 64 MiB/TC => v7x (2 TCs/chip); 128 MiB => v5e/v6e (1 TC/chip).
            num_cores = 2 if vmem_cap <= 64 * _MIB else 1
    except Exception:
        pass
    return vmem_cap, max(1, int(num_cores))


# ---------------------------------------------------------------------------
# Single-pass kernel: full reduce axis resident per block.
# ---------------------------------------------------------------------------
def _rms_norm_kernel(x_ref, o_ref, *, inv_n, native_mul):
    x = x_ref[...]
    xf = x.astype(jnp.float32)
    # Sum of squares over the lane (reduce) axis, accumulated in f32.
    ssq = jnp.sum(xf * xf, axis=-1, keepdims=True)
    # rsqrt on the EUP + broadcast multiply on the VPU (instead of sqrt + div).
    scale = lax.rsqrt(ssq * inv_n)
    if native_mul:
        # 16-bit floats: multiply in the native dtype (ssq stayed f32).
        o_ref[...] = (x * scale.astype(x.dtype)).astype(o_ref.dtype)
    else:
        o_ref[...] = (xf * scale).astype(o_ref.dtype)


# ---------------------------------------------------------------------------
# Two-pass kernels (reduce extent too large for VMEM).
# ---------------------------------------------------------------------------
def _ssq_kernel(x_ref, scale_ref, *, reduce_size, col_tile, inv_n, needs_mask):
    k = pl.program_id(1)
    last = pl.num_programs(1) - 1

    @pl.when(k == 0)
    def _():
        scale_ref[...] = jnp.zeros_like(scale_ref)

    def _accum(mask_tail):
        x = x_ref[...].astype(jnp.float32)
        if mask_tail:
            col_ids = lax.broadcasted_iota(jnp.int32, x.shape, 1)
            x = jnp.where(col_ids + k * col_tile < reduce_size, x, 0.0)
        scale_ref[...] += jnp.sum(x * x, axis=-1, keepdims=True)

    if needs_mask:
        # Tail mask exists only in the last column chunk's code path; the
        # steady-state accumulation loop carries no iota/compare/select.
        @pl.when(k != last)
        def _():
            _accum(False)

        @pl.when(k == last)
        def _():
            _accum(True)
    else:
        _accum(False)

    @pl.when(k == last)
    def _():
        scale_ref[...] = lax.rsqrt(scale_ref[...] * inv_n)


def _apply_scale_kernel(x_ref, scale_ref, o_ref, *, native_mul):
    x = x_ref[...]
    scale = scale_ref[...]
    if native_mul:
        o_ref[...] = (x * scale.astype(x.dtype)).astype(o_ref.dtype)
    else:
        o_ref[...] = (x.astype(jnp.float32) * scale).astype(o_ref.dtype)


# ---------------------------------------------------------------------------
# Wrapper
# ---------------------------------------------------------------------------
@functools.partial(jax.jit, static_argnames=("dim",))
def variance_instance_norm(x, dim):
    """Normalize x by the RMS over its last `dim` axes (no eps, like the module)."""
    shape = x.shape
    ndim = len(shape)
    assert 1 <= dim <= ndim

    reduce_size = 1
    for s in shape[ndim - dim:]:
        reduce_size *= int(s)
    rows = 1
    for s in shape[: ndim - dim]:
        rows *= int(s)
    rows = max(rows, 1)
    reduce_size = max(reduce_size, 1)

    itemsize = jnp.dtype(x.dtype).itemsize
    native_mul = (itemsize <= 2) and jnp.issubdtype(x.dtype, jnp.floating)
    # Packed sublane tiling: 8 rows (4B dtypes), 16 (2B), 32 (1B).
    row_align = max(8, 32 // max(itemsize, 1))

    vmem_cap, num_cores = _tpu_params()
    # Budget blocks in f32 bytes regardless of input dtype: leaves headroom for
    # the f32 upcast temporaries and Mosaic internal scratch (critical on v7x).
    budget_itemsize = 4
    if vmem_cap > 64 * _MIB:          # v5e / v6e: 128 MiB VMEM per core.
        target_block_bytes = 8 * _MIB
        max_block_bytes = vmem_cap // 6
    else:                             # v7x: 64 MiB VMEM per core.
        target_block_bytes = 2 * _MIB
        max_block_bytes = vmem_cap // 12
    vmem_limit = int(vmem_cap * 0.8)

    inv_n = 1.0 / float(reduce_size)
    out_shape2 = jax.ShapeDtypeStruct((rows, reduce_size), x.dtype)

    # NOTE: for contiguous inputs this reshape is a metadata-only view.
    x2 = x.reshape(rows, reduce_size)

    row_bytes_budget = reduce_size * budget_itemsize
    min_row_tile = min(rows, row_align)

    # TODO(synk): when reduce_size is narrow / not a multiple of 128, a
    # lane-dense 3-D repack (rows, r_sub, 128*k) would avoid padded lanes and
    # masked stores; not implemented (common spatial shapes are 128-multiples).

    if min_row_tile * row_bytes_budget <= max_block_bytes:
        # ---------------- single pass: full reduce axis per block ------------
        if rows <= row_align:
            row_tile = rows  # full extent (always a legal block shape)
        else:
            row_tile = _round_down(target_block_bytes // row_bytes_budget, row_align)
            row_tile = max(row_tile, row_align)
            row_tile = min(
                row_tile,
                max(row_align, _round_down(max_block_bytes // row_bytes_budget, row_align)),
            )
            # >= 2 blocks per TensorCore so the BlockSpec pipeline double-buffers
            # on every core (v7x has 2 TCs; exposed DMA otherwise).
            min_blocks = 2 * num_cores
            if _cdiv(rows, row_tile) < min_blocks:
                row_tile = max(row_align, _round_up(_cdiv(rows, min_blocks), row_align))
            row_tile = min(row_tile, _round_up(rows, row_align))
        grid = (_cdiv(rows, row_tile),)

        cost = pl.CostEstimate(
            flops=3 * rows * reduce_size,
            transcendentals=rows,
            bytes_accessed=2 * rows * reduce_size * itemsize,
        )

        out2 = pl.pallas_call(
            functools.partial(_rms_norm_kernel, inv_n=inv_n, native_mul=native_mul),
            out_shape=out_shape2,
            grid_spec=pltpu.PrefetchScalarGridSpec(
                num_scalar_prefetch=0,
                grid=grid,
                in_specs=[pl.BlockSpec((row_tile, reduce_size), lambda i: (i, 0))],
                out_specs=pl.BlockSpec((row_tile, reduce_size), lambda i: (i, 0)),
            ),
            compiler_params=pltpu.CompilerParams(
                dimension_semantics=("parallel",),
                vmem_limit_bytes=vmem_limit,
            ),
            cost_estimate=cost,
        )(x2)
    else:
        # ------------- two passes: reduce axis chunked over the grid ---------
        row_tile = rows if rows <= row_align else row_align
        col_tile = _round_down(
            max(target_block_bytes // (row_tile * budget_itemsize), 128), 128
        )
        col_tile = max(128, col_tile)
        col_tile = min(col_tile, max(128, _round_down(reduce_size, 128)))
        row_grid = _cdiv(rows, row_tile)
        col_grid = _cdiv(reduce_size, col_tile)
        needs_mask = (reduce_size % col_tile) != 0

        cost1 = pl.CostEstimate(
            flops=2 * rows * reduce_size,
            transcendentals=rows,
            bytes_accessed=rows * reduce_size * itemsize + rows * 4,
        )
        cost2 = pl.CostEstimate(
            flops=rows * reduce_size,
            transcendentals=0,
            bytes_accessed=2 * rows * reduce_size * itemsize + rows * 4,
        )

        # Pass 1: per-row scale = rsqrt(mean(x^2)).
        scale = pl.pallas_call(
            functools.partial(
                _ssq_kernel,
                reduce_size=reduce_size,
                col_tile=col_tile,
                inv_n=inv_n,
                needs_mask=needs_mask,
            ),
            out_shape=jax.ShapeDtypeStruct((rows, 1), jnp.float32),
            grid_spec=pltpu.PrefetchScalarGridSpec(
                num_scalar_prefetch=0,
                grid=(row_grid, col_grid),
                in_specs=[pl.BlockSpec((row_tile, col_tile), lambda i, k: (i, k))],
                out_specs=pl.BlockSpec((row_tile, 1), lambda i, k: (i, 0)),
            ),
            compiler_params=pltpu.CompilerParams(
                dimension_semantics=("parallel", "arbitrary"),
                vmem_limit_bytes=vmem_limit,
            ),
            cost_estimate=cost1,
        )(x2)

        # Pass 2: broadcast multiply by the per-row scale.
        out2 = pl.pallas_call(
            functools.partial(_apply_scale_kernel, native_mul=native_mul),
            out_shape=out_shape2,
            grid_spec=pltpu.PrefetchScalarGridSpec(
                num_scalar_prefetch=0,
                grid=(row_grid, col_grid),
                in_specs=[
                    pl.BlockSpec((row_tile, col_tile), lambda i, k: (i, k)),
                    pl.BlockSpec((row_tile, 1), lambda i, k: (i, 0)),
                ],
                out_specs=pl.BlockSpec((row_tile, col_tile), lambda i, k: (i, k)),
            ),
            compiler_params=pltpu.CompilerParams(
                dimension_semantics=("parallel", "parallel"),
                vmem_limit_bytes=vmem_limit,
            ),
            cost_estimate=cost2,
        )(x2, scale)

    return out2.reshape(shape)


def _reference(x, dim):
    axes = tuple(range(x.ndim - dim, x.ndim))
    var = jnp.sqrt(jnp.mean(x * x, axis=axes, keepdims=True))
    return x / var


if __name__ == "__main__":
    key = jax.random.PRNGKey(0)
    k0, k1 = jax.random.split(key)

    # NCHW input, normalize over the last 2 (spatial) dims like the module with dim=2.
    N, C, H, W = 2, 4, 16, 16
    DIM = 2
    x = jax.random.normal(k0, (N, C, H, W), dtype=jnp.float32)

    out = jax.block_until_ready(variance_instance_norm(x, DIM))
    ref = _reference(x, DIM)
    assert out.shape == x.shape
    assert jnp.allclose(out, ref, atol=1e-5, rtol=1e-5), "mismatch vs reference"

    # Row count that is not a multiple of the sublane alignment (masked partial block).
    x_odd = jax.random.normal(k1, (3, 5, 16, 16), dtype=jnp.float32)
    out_odd = jax.block_until_ready(variance_instance_norm(x_odd, DIM))
    ref_odd = _reference(x_odd, DIM)
    assert jnp.allclose(out_odd, ref_odd, atol=1e-5, rtol=1e-5), "mismatch (odd rows)"

    print("KERNEL_OK")
</pallas_src>

<mosaic_0001>
module attributes {stable_mosaic.version = 11 : i64} {
  func.func @_rms_norm_kernel(%arg0: i32, %arg1: memref<8x256xf32, #tpu.memory_space<vmem>>, %arg2: memref<8x256xf32, #tpu.memory_space<vmem>>) attributes {dimension_semantics = [#tpu.dimension_semantics<parallel>], iteration_bounds = array<i64: 1>, scalar_prefetch = 0 : i64, scratch_operands = 0 : i64, tpu.core_type = #tpu.core_type<tc>, window_params = [{transform_indices = @transform_0, window_bounds = array<i64: 8, 256>}, {transform_indices = @transform_1, window_bounds = array<i64: 8, 256>}]} {
    %c0 = arith.constant 0 : index
    %c0_0 = arith.constant 0 : index
    %0 = vector.load %arg1[%c0, %c0_0] : memref<8x256xf32, #tpu.memory_space<vmem>>, vector<8x256xf32>
    %1 = arith.mulf %0, %0 : vector<8x256xf32>
    %cst = arith.constant dense<0.000000e+00> : vector<8xf32>
    %2 = vector.multi_reduction <add>, %1, %cst [1] : vector<8x256xf32> to vector<8xf32>
    %3 = vector.shape_cast %2 : vector<8xf32> to vector<8x1xf32>
    %cst_1 = arith.constant 3.906250e-03 : f32
    %4 = vector.broadcast %cst_1 : f32 to vector<8x1xf32>
    %5 = arith.mulf %3, %4 : vector<8x1xf32>
    %6 = math.rsqrt %5 : vector<8x1xf32>
    %7 = vector.broadcast %6 : vector<8x1xf32> to vector<8x256xf32>
    %8 = arith.mulf %0, %7 : vector<8x256xf32>
    %c0_2 = arith.constant 0 : index
    %c0_3 = arith.constant 0 : index
    %9 = vector.load %arg2[%c0_2, %c0_3] : memref<8x256xf32, #tpu.memory_space<vmem>>, vector<8x256xf32>
    tpu.vector_store %arg2[%c0_2, %c0_3], %8 {strides = array<i32>} : memref<8x256xf32, #tpu.memory_space<vmem>>, vector<8x256xf32>,
    return
  }
  func.func @transform_0(%arg0: i32) -> (i32, i32) {
    %c0_i32 = arith.constant 0 : i32
    %c0_i32_0 = arith.constant 0 : i32
    return %arg0, %c0_i32 : i32, i32
  }
  func.func @transform_1(%arg0: i32) -> (i32, i32) {
    %c0_i32 = arith.constant 0 : i32
    %c0_i32_0 = arith.constant 0 : i32
    return %arg0, %c0_i32 : i32, i32
  }
}

</mosaic_0001>

<bundles_post_ra>
// kernel: variance_instance_norm.1
= control target key start
LH: loop header
LB: loop body
LE: loop exit
PB: predicated region body
PF: predicated region fallthrough
CT: control target
= control target key end

     0   :  { %s58_s0 = inlined_call_operand.vmem [shape: f32[8,256], index: 0, kind: input, shape index: {}]   ;;  %s59_s1 = inlined_call_operand.vmem [shape: f32[8,256], index: 1, kind: output, shape index: {}]  }
   0x1   :  { %v8_v0 = vld [vmem:[%s58_s0] sm:$0xff]  ;;  %v9_v1 = vld [vmem:[%s58_s0 + $0x8] sm:$0xff] }
   0x2   :  { %v10_v2 = vmul.f32 %v8_v0, %v8_v0  ;;  %v11_v3 = vmul.f32 %v9_v1, %v9_v1 }
   0x4   :  { %v12_v4 = vadd.f32 %v11_v3, %v10_v2 }
   0x6   :  { %13 = vadd.xlane.f32.xlu0 %v12_v4 }
  0x79   :  { %v14_v5 = vpop.xlane.xlu0 %13 }
  0x7a   :  { %v15_v6 = vmul.f32 0.00390625, %v14_v5 }
  0x7c   :  { %34 = vrsqrt.f32 %v15_v6  ;;  %vm22_vm1 = vweird.f32 %v15_v6 }
  0x82   :  { %v35_v7 = vpop.eup %34 }
  0x83   :  { %v17_v8 = vmul.f32 %v35_v7, %v15_v6  ;;  %vm23_vm0 = vweird.f32 %v35_v7 }
  0x84   :  { %vm24_vm2 = vmor %vm22_vm1, %vm23_vm0 }
  0x85   :  { %v18_v9 = vmul.f32 %v35_v7, %v17_v8 }
  0x87   :  { %v19_v10 = vmul.f32 0.5, %v18_v9 }
  0x89   :  { %v20_v11 = vsub.f32 1.5, %v19_v10 }
  0x8b   :  { %v21_v12 = vmul.f32 %v35_v7, %v20_v11 }
  0x8d   :  { %v25_v13 = vsel %vm24_vm2, %v35_v7, %v21_v12 }
  0x8e   :  { %v26_v14 = vmul.f32 %v25_v13, %v8_v0  ;;  %v27_v15 = vmul.f32 %v25_v13, %v9_v1 }
  0x90   :  { %28 = vst [vmem:[%s59_s1] sm:$0xff] %v26_v14 }
  0x91   :  { %29 = vst [vmem:[%s59_s1 + $0x8] sm:$0xff] %v27_v15 }

</bundles_post_ra>
